<compile_context>
chip_gen: v7x
topology: tpu7x:2x2x1
jax: 0.10.0
libtpu: 0.0.40
codegen_flags: <defaults>
</compile_context>

<pallas_src>
import functools

import jax
import jax.numpy as jnp
from jax.experimental import pallas as pl
from jax.experimental.pallas import tpu as pltpu

LANE = 128  # vreg lane width: pad feature / class dims to this


# ---------------------------------------------------------------------------
# Pallas kernel: entire GCN forward, fused
# ---------------------------------------------------------------------------
def _gcn_fused_kernel(a_ref, x_ref,
                      w1_ref, b1_ref, w2_ref, b2_ref, w3_ref, b3_ref,
                      o_ref):
    # A is the raw 0/1 adjacency, a[i, j] = edge j -> i.  Values 0/1 are exact
    # in bf16; promote to f32 so the degree sums are exact too.
    a = a_ref[...].astype(jnp.float32)                                   # (N, N)

    # Degree normalizations, computed in-kernel (XLU reduces + EUP rsqrt);
    # clamp degree >= 1 exactly like DGL.
    din = jax.lax.rsqrt(jnp.maximum(jnp.sum(a, axis=1, keepdims=True), 1.0))   # (N, 1)
    dout = jax.lax.rsqrt(jnp.maximum(jnp.sum(a, axis=0, keepdims=True), 1.0))  # (1, N)

    # Fold the source normalization into A once (column scale); reused by both
    # GraphConv layers.  bf16 operand for the MXU, f32 accumulation.
    a_n = (a * dout).astype(jnp.bfloat16)                                 # (N, N)

    def graph_conv(h_bf, w_ref, b_ref):
        # norm='both':  relu( D_in^{-1/2} (A D_out^{-1/2}) H W + b )
        agg = jnp.dot(a_n, h_bf, preferred_element_type=jnp.float32) * din
        z = jnp.dot(agg.astype(jnp.bfloat16), w_ref[...],
                    preferred_element_type=jnp.float32) + b_ref[...]
        return jnp.maximum(z, 0.0)                                        # ReLU

    h1 = graph_conv(x_ref[...], w1_ref, b1_ref)                 # X arrives bf16
    h2 = graph_conv(h1.astype(jnp.bfloat16), w2_ref, b2_ref)
    # MLP head (mlp_layers=1): plain Linear, no aggregation, no activation.
    out = jnp.dot(h2.astype(jnp.bfloat16), w3_ref[...],
                  preferred_element_type=jnp.float32) + b3_ref[...]
    o_ref[...] = out.astype(o_ref.dtype)


# ---------------------------------------------------------------------------
# Wrapper: one-time prep + jitted per-call forward
# ---------------------------------------------------------------------------
def _pad_to(x, rows, cols):
    return jnp.pad(x, ((0, rows - x.shape[0]), (0, cols - x.shape[1])))


def _full_spec(shape):
    return pl.BlockSpec(shape, lambda i: (0,) * len(shape))


def prepare_adj(adj):
    """One-time: ship the 0/1 adjacency as bf16 (exact for 0/1 entries)."""
    return adj.astype(jnp.bfloat16)


def prepare_params(params):
    """One-time: pad weights to the 128-lane width and cast to bf16."""
    (w1, b1), (w2, b2) = params["conv"]
    w3, b3 = params["mlp"]
    prep = {
        "w1": _pad_to(w1, LANE, LANE).astype(jnp.bfloat16),
        "w2": _pad_to(w2, LANE, LANE).astype(jnp.bfloat16),
        "w3": _pad_to(w3, LANE, LANE).astype(jnp.bfloat16),
        "b1": _pad_to(b1.reshape(1, -1).astype(jnp.float32), 1, LANE),
        "b2": _pad_to(b2.reshape(1, -1).astype(jnp.float32), 1, LANE),
        "b3": _pad_to(b3.reshape(1, -1).astype(jnp.float32), 1, LANE),
    }
    return prep, w3.shape[1]  # (prepared arrays, num_classes)


@functools.partial(jax.jit, static_argnames="num_classes")
def gcn_forward(a_bf, x, prep, *, num_classes):
    """GCN forward with the whole network in a single Pallas kernel call.

    a_bf : (N, N) bf16 adjacency from prepare_adj
    x    : (N, F) node features (any float dtype)
    prep : padded/cast parameters from prepare_params
    """
    n = a_bf.shape[0]

    # Only X changes per call: pad lanes to 128 and cast to bf16 (MXU operand).
    x_p = _pad_to(x, n, LANE).astype(jnp.bfloat16)

    flops = 2 * (2 * n * n * LANE) + 3 * (2 * n * LANE * LANE)
    bytes_accessed = (2 * n * n            # A (bf16)
                      + 2 * n * LANE       # X (bf16)
                      + 3 * 2 * LANE * LANE + 3 * 4 * LANE   # weights + biases
                      + 4 * n * LANE)      # output (f32)

    out_p = pl.pallas_call(
        _gcn_fused_kernel,
        out_shape=jax.ShapeDtypeStruct((n, LANE), jnp.float32),
        grid=(1,),
        in_specs=[
            _full_spec((n, n)),        # A (bf16, raw 0/1)
            _full_spec((n, LANE)),     # X (bf16, padded)
            _full_spec((LANE, LANE)),  # W1
            _full_spec((1, LANE)),     # b1
            _full_spec((LANE, LANE)),  # W2
            _full_spec((1, LANE)),     # b2
            _full_spec((LANE, LANE)),  # W3
            _full_spec((1, LANE)),     # b3
        ],
        out_specs=_full_spec((n, LANE)),
        compiler_params=pltpu.CompilerParams(dimension_semantics=("arbitrary",)),
        cost_estimate=pl.CostEstimate(flops=flops, transcendentals=2 * n,
                                      bytes_accessed=bytes_accessed),
    )(a_bf, x_p, prep["w1"], prep["b1"], prep["w2"], prep["b2"],
      prep["w3"], prep["b3"])

    # Padded output columns are exactly zero; slice out the real logits.
    return out_p[:, :num_classes]
    # NOTE (scale-up path, not needed at N=64):
    #  * many small graphs -> add a leading batch grid axis marked "parallel"
    #    (per-graph blocks of A/X/out); this also feeds both v7x TensorCores.
    #  * large N -> un-fuse into per-layer calls or row-tile with
    #    ("parallel", "arbitrary") semantics and an f32 accumulator; budget
    #    VMEM per generation (v7x 64 MiB phys / 32 MiB scoped, v5e 16 MiB
    #    scoped default -> set vmem_limit_bytes), optionally fp8 A on v7x.


# ---------------------------------------------------------------------------
# Pure-JAX references
# ---------------------------------------------------------------------------
def ref_forward_f32(adj, x, params):
    deg_in = jnp.clip(adj.sum(1), 1.0, None)
    deg_out = jnp.clip(adj.sum(0), 1.0, None)
    a_norm = (deg_in ** -0.5)[:, None] * adj * (deg_out ** -0.5)[None, :]
    h = x
    for (w, b) in params["conv"]:
        h = jnp.maximum(a_norm @ h @ w + b, 0.0)
    w3, b3 = params["mlp"]
    return h @ w3 + b3


def ref_forward_bf16(adj, x, params):
    """Mirrors the kernel's bf16 cast points (f32 accumulation everywhere)."""
    a = adj.astype(jnp.float32)
    din = jax.lax.rsqrt(jnp.maximum(a.sum(1, keepdims=True), 1.0))
    dout = jax.lax.rsqrt(jnp.maximum(a.sum(0, keepdims=True), 1.0))
    a_n = (a * dout).astype(jnp.bfloat16)
    h = x.astype(jnp.bfloat16)
    for (w, b) in params["conv"]:
        agg = jnp.dot(a_n, h, preferred_element_type=jnp.float32) * din
        z = jnp.dot(agg.astype(jnp.bfloat16), w.astype(jnp.bfloat16),
                    preferred_element_type=jnp.float32) + b
        h = jnp.maximum(z, 0.0).astype(jnp.bfloat16)
    w3, b3 = params["mlp"]
    return jnp.dot(h, w3.astype(jnp.bfloat16),
                   preferred_element_type=jnp.float32) + b3


# ---------------------------------------------------------------------------
# Deterministic parameter init (shapes implied by GCN.__init__ defaults)
# ---------------------------------------------------------------------------
def init_params(key, in_feats, h_feats, num_classes, num_layers):
    params = {"conv": [], "mlp": None}
    dims = [in_feats] + [h_feats] * num_layers
    for li in range(num_layers):
        key, kw, kb = jax.random.split(key, 3)
        bound = 1.0 / (dims[li] ** 0.5)
        w = jax.random.uniform(kw, (dims[li], dims[li + 1]), jnp.float32, -bound, bound)
        b = jax.random.uniform(kb, (dims[li + 1],), jnp.float32, -bound, bound)
        params["conv"].append((w, b))
    key, kw, kb = jax.random.split(key, 3)
    bound = 1.0 / (h_feats ** 0.5)
    w3 = jax.random.uniform(kw, (h_feats, num_classes), jnp.float32, -bound, bound)
    b3 = jax.random.uniform(kb, (num_classes,), jnp.float32, -bound, bound)
    params["mlp"] = (w3, b3)
    return params


# ---------------------------------------------------------------------------
# Main
# ---------------------------------------------------------------------------
if __name__ == "__main__":
    N = 64          # graph nodes
    IN_FEATS = 16
    H_FEATS = 32
    NUM_CLASSES = 2
    NUM_LAYERS = 2  # GraphConv layers; mlp_layers=1 -> single Linear head

    key = jax.random.PRNGKey(0)
    k_feat, k_adj, k_param = jax.random.split(key, 3)

    # synthetic node features and random directed adjacency, no self-loops
    x = jax.random.normal(k_feat, (N, IN_FEATS), jnp.float32)
    adj = (jax.random.uniform(k_adj, (N, N)) < 0.1).astype(jnp.float32)
    adj = adj * (1.0 - jnp.eye(N, dtype=jnp.float32))

    params = init_params(k_param, IN_FEATS, H_FEATS, NUM_CLASSES, NUM_LAYERS)

    # one-time prep (hoisted out of the per-call path)
    a_bf = prepare_adj(adj)
    prep, n_cls = prepare_params(params)

    out = jax.block_until_ready(gcn_forward(a_bf, x, prep, num_classes=n_cls))
    assert out.shape == (N, NUM_CLASSES)

    # tight check vs a reference that mirrors the kernel's bf16/f32-acc math
    ref_b = ref_forward_bf16(adj, x, params)
    assert jnp.allclose(out, ref_b, atol=2e-3, rtol=2e-3), float(jnp.max(jnp.abs(out - ref_b)))
    # loose sanity check vs full-f32 math (bf16 MXU operands cost ~1e-2 abs)
    ref_f = ref_forward_f32(adj, x, params)
    assert jnp.allclose(out, ref_f, atol=1e-1, rtol=1e-1), float(jnp.max(jnp.abs(out - ref_f)))

    print("KERNEL_OK")
</pallas_src>

<mosaic_0001>
module attributes {stable_mosaic.version = 11 : i64} {
  func.func @_gcn_fused_kernel(%arg0: i32, %arg1: memref<64x64xbf16, #tpu.memory_space<vmem>>, %arg2: memref<64x128xbf16, #tpu.memory_space<vmem>>, %arg3: memref<128x128xbf16, #tpu.memory_space<vmem>>, %arg4: memref<1x128xf32, #tpu.memory_space<vmem>>, %arg5: memref<128x128xbf16, #tpu.memory_space<vmem>>, %arg6: memref<1x128xf32, #tpu.memory_space<vmem>>, %arg7: memref<128x128xbf16, #tpu.memory_space<vmem>>, %arg8: memref<1x128xf32, #tpu.memory_space<vmem>>, %arg9: memref<64x128xf32, #tpu.memory_space<vmem>>) attributes {dimension_semantics = [#tpu.dimension_semantics<arbitrary>], iteration_bounds = array<i64: 1>, scalar_prefetch = 0 : i64, scratch_operands = 0 : i64, tpu.core_type = #tpu.core_type<tc>, window_params = [{pipeline_mode = #tpu.pipeline_mode<synchronous>, transform_indices = @transform_0, window_bounds = array<i64: 64, 64>}, {pipeline_mode = #tpu.pipeline_mode<synchronous>, transform_indices = @transform_1, window_bounds = array<i64: 64, 128>}, {pipeline_mode = #tpu.pipeline_mode<synchronous>, transform_indices = @transform_2, window_bounds = array<i64: 128, 128>}, {pipeline_mode = #tpu.pipeline_mode<synchronous>, transform_indices = @transform_3, window_bounds = array<i64: 1, 128>}, {pipeline_mode = #tpu.pipeline_mode<synchronous>, transform_indices = @transform_4, window_bounds = array<i64: 128, 128>}, {pipeline_mode = #tpu.pipeline_mode<synchronous>, transform_indices = @transform_5, window_bounds = array<i64: 1, 128>}, {pipeline_mode = #tpu.pipeline_mode<synchronous>, transform_indices = @transform_6, window_bounds = array<i64: 128, 128>}, {pipeline_mode = #tpu.pipeline_mode<synchronous>, transform_indices = @transform_7, window_bounds = array<i64: 1, 128>}, {pipeline_mode = #tpu.pipeline_mode<synchronous>, transform_indices = @transform_8, window_bounds = array<i64: 64, 128>}]} {
    %c0 = arith.constant 0 : index
    %c0_0 = arith.constant 0 : index
    %0 = vector.load %arg1[%c0, %c0_0] : memref<64x64xbf16, #tpu.memory_space<vmem>>, vector<64x64xbf16>
    %1 = arith.extf %0 : vector<64x64xbf16> to vector<64x64xf32>
    %cst = arith.constant dense<0.000000e+00> : vector<64xf32>
    %2 = vector.multi_reduction <add>, %1, %cst [1] : vector<64x64xf32> to vector<64xf32>
    %3 = vector.shape_cast %2 : vector<64xf32> to vector<64x1xf32>
    %cst_1 = arith.constant 1.000000e+00 : f32
    %4 = vector.broadcast %cst_1 : f32 to vector<64x1xf32>
    %5 = arith.maximumf %3, %4 : vector<64x1xf32>
    %6 = math.rsqrt %5 : vector<64x1xf32>
    %cst_2 = arith.constant dense<0.000000e+00> : vector<64xf32>
    %7 = vector.multi_reduction <add>, %1, %cst_2 [0] : vector<64x64xf32> to vector<64xf32>
    %8 = vector.shape_cast %7 : vector<64xf32> to vector<1x64xf32>
    %cst_3 = arith.constant 1.000000e+00 : f32
    %9 = vector.broadcast %cst_3 : f32 to vector<1x64xf32>
    %10 = arith.maximumf %8, %9 : vector<1x64xf32>
    %11 = math.rsqrt %10 : vector<1x64xf32>
    %12 = vector.broadcast %11 : vector<1x64xf32> to vector<64x64xf32>
    %13 = arith.mulf %1, %12 : vector<64x64xf32>
    %14 = arith.truncf %13 : vector<64x64xf32> to vector<64x64xbf16>
    %c0_4 = arith.constant 0 : index
    %c0_5 = arith.constant 0 : index
    %15 = vector.load %arg2[%c0_4, %c0_5] : memref<64x128xbf16, #tpu.memory_space<vmem>>, vector<64x128xbf16>
    %cst_6 = arith.constant dense<0.000000e+00> : vector<64x128xf32>
    %16 = tpu.matmul %14, %15, %cst_6 {dimension_numbers = #tpu.dot_dimension_numbers<[1], [0], [0], [1], [0, 0, 1, 1], [], []>} : vector<64x64xbf16>, vector<64x128xbf16>, vector<64x128xf32> -> vector<64x128xf32>
    %17 = vector.broadcast %6 : vector<64x1xf32> to vector<64x128xf32>
    %18 = arith.mulf %16, %17 : vector<64x128xf32>
    %19 = arith.truncf %18 : vector<64x128xf32> to vector<64x128xbf16>
    %c0_7 = arith.constant 0 : index
    %c0_8 = arith.constant 0 : index
    %20 = vector.load %arg3[%c0_7, %c0_8] : memref<128x128xbf16, #tpu.memory_space<vmem>>, vector<128x128xbf16>
    %cst_9 = arith.constant dense<0.000000e+00> : vector<64x128xf32>
    %21 = tpu.matmul %19, %20, %cst_9 {dimension_numbers = #tpu.dot_dimension_numbers<[1], [0], [0], [1], [0, 0, 1, 1], [], []>} : vector<64x128xbf16>, vector<128x128xbf16>, vector<64x128xf32> -> vector<64x128xf32>
    %c0_10 = arith.constant 0 : index
    %c0_11 = arith.constant 0 : index
    %22 = vector.load %arg4[%c0_10, %c0_11] : memref<1x128xf32, #tpu.memory_space<vmem>>, vector<1x128xf32>
    %23 = vector.broadcast %22 : vector<1x128xf32> to vector<64x128xf32>
    %24 = arith.addf %21, %23 : vector<64x128xf32>
    %cst_12 = arith.constant 0.000000e+00 : f32
    %25 = vector.broadcast %cst_12 : f32 to vector<64x128xf32>
    %26 = arith.maximumf %24, %25 : vector<64x128xf32>
    %27 = arith.truncf %26 : vector<64x128xf32> to vector<64x128xbf16>
    %cst_13 = arith.constant dense<0.000000e+00> : vector<64x128xf32>
    %28 = tpu.matmul %14, %27, %cst_13 {dimension_numbers = #tpu.dot_dimension_numbers<[1], [0], [0], [1], [0, 0, 1, 1], [], []>} : vector<64x64xbf16>, vector<64x128xbf16>, vector<64x128xf32> -> vector<64x128xf32>
    %29 = vector.broadcast %6 : vector<64x1xf32> to vector<64x128xf32>
    %30 = arith.mulf %28, %29 : vector<64x128xf32>
    %31 = arith.truncf %30 : vector<64x128xf32> to vector<64x128xbf16>
    %c0_14 = arith.constant 0 : index
    %c0_15 = arith.constant 0 : index
    %32 = vector.load %arg5[%c0_14, %c0_15] : memref<128x128xbf16, #tpu.memory_space<vmem>>, vector<128x128xbf16>
    %cst_16 = arith.constant dense<0.000000e+00> : vector<64x128xf32>
    %33 = tpu.matmul %31, %32, %cst_16 {dimension_numbers = #tpu.dot_dimension_numbers<[1], [0], [0], [1], [0, 0, 1, 1], [], []>} : vector<64x128xbf16>, vector<128x128xbf16>, vector<64x128xf32> -> vector<64x128xf32>
    %c0_17 = arith.constant 0 : index
    %c0_18 = arith.constant 0 : index
    %34 = vector.load %arg6[%c0_17, %c0_18] : memref<1x128xf32, #tpu.memory_space<vmem>>, vector<1x128xf32>
    %35 = vector.broadcast %34 : vector<1x128xf32> to vector<64x128xf32>
    %36 = arith.addf %33, %35 : vector<64x128xf32>
    %cst_19 = arith.constant 0.000000e+00 : f32
    %37 = vector.broadcast %cst_19 : f32 to vector<64x128xf32>
    %38 = arith.maximumf %36, %37 : vector<64x128xf32>
    %39 = arith.truncf %38 : vector<64x128xf32> to vector<64x128xbf16>
    %c0_20 = arith.constant 0 : index
    %c0_21 = arith.constant 0 : index
    %40 = vector.load %arg7[%c0_20, %c0_21] : memref<128x128xbf16, #tpu.memory_space<vmem>>, vector<128x128xbf16>
    %cst_22 = arith.constant dense<0.000000e+00> : vector<64x128xf32>
    %41 = tpu.matmul %39, %40, %cst_22 {dimension_numbers = #tpu.dot_dimension_numbers<[1], [0], [0], [1], [0, 0, 1, 1], [], []>} : vector<64x128xbf16>, vector<128x128xbf16>, vector<64x128xf32> -> vector<64x128xf32>
    %c0_23 = arith.constant 0 : index
    %c0_24 = arith.constant 0 : index
    %42 = vector.load %arg8[%c0_23, %c0_24] : memref<1x128xf32, #tpu.memory_space<vmem>>, vector<1x128xf32>
    %43 = vector.broadcast %42 : vector<1x128xf32> to vector<64x128xf32>
    %44 = arith.addf %41, %43 : vector<64x128xf32>
    %c0_25 = arith.constant 0 : index
    %c0_26 = arith.constant 0 : index
    %45 = vector.load %arg9[%c0_25, %c0_26] : memref<64x128xf32, #tpu.memory_space<vmem>>, vector<64x128xf32>
    tpu.vector_store %arg9[%c0_25, %c0_26], %44 {strides = array<i32>} : memref<64x128xf32, #tpu.memory_space<vmem>>, vector<64x128xf32>,
    return
  }
  func.func @transform_0(%arg0: i32) -> (i32, i32) {
    %c0_i32 = arith.constant 0 : i32
    %c0_i32_0 = arith.constant 0 : i32
    %c0_i32_1 = arith.constant 0 : i32
    return %c0_i32, %c0_i32_0 : i32, i32
  }
  func.func @transform_1(%arg0: i32) -> (i32, i32) {
    %c0_i32 = arith.constant 0 : i32
    %c0_i32_0 = arith.constant 0 : i32
    %c0_i32_1 = arith.constant 0 : i32
    return %c0_i32, %c0_i32_0 : i32, i32
  }
  func.func @transform_2(%arg0: i32) -> (i32, i32) {
    %c0_i32 = arith.constant 0 : i32
    %c0_i32_0 = arith.constant 0 : i32
    %c0_i32_1 = arith.constant 0 : i32
    return %c0_i32, %c0_i32_0 : i32, i32
  }
  func.func @transform_3(%arg0: i32) -> (i32, i32) {
    %c0_i32 = arith.constant 0 : i32
    %c0_i32_0 = arith.constant 0 : i32
    %c0_i32_1 = arith.constant 0 : i32
    return %c0_i32, %c0_i32_0 : i32, i32
  }
  func.func @transform_4(%arg0: i32) -> (i32, i32) {
    %c0_i32 = arith.constant 0 : i32
    %c0_i32_0 = arith.constant 0 : i32
    %c0_i32_1 = arith.constant 0 : i32
    return %c0_i32, %c0_i32_0 : i32, i32
  }
  func.func @transform_5(%arg0: i32) -> (i32, i32) {
    %c0_i32 = arith.constant 0 : i32
    %c0_i32_0 = arith.constant 0 : i32
    %c0_i32_1 = arith.constant 0 : i32
    return %c0_i32, %c0_i32_0 : i32, i32
  }
  func.func @transform_6(%arg0: i32) -> (i32, i32) {
    %c0_i32 = arith.constant 0 : i32
    %c0_i32_0 = arith.constant 0 : i32
    %c0_i32_1 = arith.constant 0 : i32
    return %c0_i32, %c0_i32_0 : i32, i32
  }
  func.func @transform_7(%arg0: i32) -> (i32, i32) {
    %c0_i32 = arith.constant 0 : i32
    %c0_i32_0 = arith.constant 0 : i32
    %c0_i32_1 = arith.constant 0 : i32
    return %c0_i32, %c0_i32_0 : i32, i32
  }
  func.func @transform_8(%arg0: i32) -> (i32, i32) {
    %c0_i32 = arith.constant 0 : i32
    %c0_i32_0 = arith.constant 0 : i32
    %c0_i32_1 = arith.constant 0 : i32
    return %c0_i32, %c0_i32_0 : i32, i32
  }
}

</mosaic_0001>

<bundles_post_ra>
// kernel: gcn_forward.1
= control target key start
LH: loop header
LB: loop body
LE: loop exit
PB: predicated region body
PF: predicated region fallthrough
CT: control target
= control target key end

     0   :  { %13 = vsyncpa [#allocation3], 0  ;;  %s1372_s0 = inlined_call_operand.hbm [shape: bf16[64,64], index: 0, kind: input, shape index: {}]   ;;  %s1373_s1 = inlined_call_operand.vmem [shape: bf16[64,128], index: 1, kind: input, shape index: {}]   ;;  %s1374_s2 = inlined_call_operand.vmem [shape: bf16[128,128], index: 2, kind: input, shape index: {}]   ;;  %s1375_s3 = inlined_call_operand.vmem [shape: f32[1,128], index: 3, kind: input, shape index: {}]   ;;  %s1376_s4 = inlined_call_operand.vmem [shape: bf16[128,128], index: 4, kind: input, shape index: {}]   ;;  %s1377_s5 = inlined_call_operand.vmem [shape: f32[1,128], index: 5, kind: input, shape index: {}]   ;;  %s1378_s6 = inlined_call_operand.hbm [shape: bf16[128,128], index: 6, kind: input, shape index: {}]   ;;  %s1379_s7 = inlined_call_operand.vmem [shape: f32[1,128], index: 7, kind: input, shape index: {}]   ;;  %s1380_s8 = inlined_call_operand.vmem [shape: f32[64,128], index: 8, kind: output, shape index: {}]  }
   0x1   :  { %14 = vsyncpa [#allocation5], 0  ;;  %s1098_s27 = smov [#allocation2]   ;;  %s1050_s9 = scalar_lea.hbm %s1372_s0, 512 }
   0x2   :  { %s20_s28 = sshll.u32 %s1098_s27, 4  ;;  %p1051_p0 = scmp.ne.s32.totalorder %s1372_s0, %s1050_s9  ;;  %s21_s28 = int_to_ptr.vmem [resolvable:$true] %s20_s28 }
   0x3   :  { %p1054_p1 = scmp.lt.u32.totalorder %s1050_s9, %s1372_s0 }
   0x5   :  { %p1056_p2 = pnand %p1054_p1, %p1051_p0 }
   0x7   :  { %1059 = shalt.err (!%p1056_p2)
}
   0x8   :  { %s1060_s14 = scalar_lea.vmem %s21_s28, 512  ;;  %p1065_p4 = scmp.lt.s32.totalorder %s21_s28, %s21_s28 }
   0x9   :  { %p1061_p3 = scmp.ne.s32.totalorder %s21_s28, %s1060_s14  ;;  %p1066_p5 = scmp.lt.s32.totalorder %s1060_s14, %s1060_s14 }
   0xb   :  { %p1067_p6 = por %p1066_p5, %p1065_p4 }
   0xd   :  { %p1068_p7 = pnand %p1067_p6, %p1061_p3 }
   0xf   :  { %1071 = shalt.err (!%p1068_p7)
}
  0x10   :  { %s1099_s15 = smov 64   ;;  %s1100_s16 = smov 4  }
  0x11   :  { %26 = dma.hbm_to_vmem [thread:$0]  %s1372_s0, 512, %s21_s28, [#allocation3], %s1099_s15, %s1099_s15, %s1100_s16  }
  0x12   :  { %s1101_s19 = smov [#allocation4]   ;;  %s1072_s23 = scalar_lea.hbm %s1378_s6, 1024 }
  0x13   :  { %s42_s20 = sshll.u32 %s1101_s19, 4  ;;  %p1073_p8 = scmp.ne.s32.totalorder %s1378_s6, %s1072_s23  ;;  %s43_s20 = int_to_ptr.vmem [resolvable:$true] %s42_s20 }
  0x14   :  { %p1076_p9 = scmp.lt.u32.totalorder %s1072_s23, %s1378_s6 }
  0x16   :  { %p1078_p10 = pnand %p1076_p9, %p1073_p8 }
  0x18   :  { %1081 = shalt.err (!%p1078_p10)
}
  0x19   :  { %s1082_s29 = scalar_lea.vmem %s43_s20, 1024  ;;  %p1087_p12 = scmp.lt.s32.totalorder %s43_s20, %s43_s20 }
  0x1a   :  { %p1083_p11 = scmp.ne.s32.totalorder %s43_s20, %s1082_s29  ;;  %p1088_p13 = scmp.lt.s32.totalorder %s1082_s29, %s1082_s29 }
  0x1c   :  { %p1089_p0 = por %p1088_p13, %p1087_p12 }
  0x1e   :  { %p1090_p1 = pnand %p1089_p0, %p1083_p11 }
  0x20   :  { %1093 = shalt.err (!%p1090_p1)
}
  0x21   :  { %48 = dma.hbm_to_vmem [thread:$0]  %s1378_s6, 1024, %s43_s20, [#allocation5], %s1099_s15, %s1099_s15, %s1100_s16  }
  0x22   :  { %1094 = dma.done.wait [#allocation3], 512  }
  0x23   :  { %1095 = vsyncadd [#allocation3], 4294966784 }
  0x24   :  { %1096 = dma.done.wait [#allocation5], 1024  }
  0x25   :  { %1097 = vsyncadd [#allocation5], 4294966272  ;;  %v1004_v0 = vld [vmem:[%s1373_s1] sm:$0xff]   ;;  %v1005_v1 = vld [vmem:[%s1373_s1 + $0x8] sm:$0xff]   ;;  %vm74_vm0 = vcmask 523264  }
  0x26   :  { %896 = vmatprep.subr.bf16.mxu0 %v1004_v0  ;;  %v1006_v2 = vld [vmem:[%s1373_s1 + $0x10] sm:$0xff]   ;;  %v1180_v3 = vld [vmem:[#allocation2] sm:$0xff]   ;;  %v1182_v4 = vld [vmem:[#allocation2 + $0x8] sm:$0xff]  }
  0x27   :  { %897 = vmatpush3.bf16.msra.mxu0 %v1004_v0  ;;  %v1184_v5 = vld [vmem:[#allocation2 + $0x10] sm:$0xff]   ;;  %v827_v6 = vunpack.c.l.bf16 %v1180_v3  ;;  %v828_v7 = vunpack.c.h.bf16 %v1180_v3  ;;  %v831_v8 = vunpack.c.l.bf16 %v1182_v4  ;;  %v832_v9 = vunpack.c.h.bf16 %v1182_v4  ;;  %v1190_v10 = vld [vmem:[#allocation2 + $0x18] sm:$0xff]   ;;  %v1008_v15 = vld [vmem:[%s1374_s2] sm:$0xff]  }
  0x28   :  { %898 = vmatprep.subr.bf16.mxu0 %v1005_v1  ;;  %v835_v11 = vunpack.c.l.bf16 %v1184_v5  ;;  %v836_v12 = vunpack.c.h.bf16 %v1184_v5  ;;  %v839_v13 = vunpack.c.l.bf16 %v1190_v10  ;;  %v840_v14 = vunpack.c.h.bf16 %v1190_v10  ;;  %v1007_v16 = vld [vmem:[%s1373_s1 + $0x18] sm:$0xff]   ;;  %v1009_v21 = vld [vmem:[%s1374_s2 + $0x8] sm:$0xff]   ;;  %912 = vmatprep.subr.bf16.mxu1 %v1008_v15  ;;  %v1010_v34 = vld [vmem:[%s1374_s2 + $0x10] sm:$0xff]  }
  0x29   :  { %v75_v17 = vsel %vm74_vm0, %v827_v6, 0.0  ;;  %v78_v18 = vsel %vm74_vm0, %v828_v7, 0.0  ;;  %v81_v19 = vsel %vm74_vm0, %v831_v8, 0.0  ;;  %v84_v20 = vsel %vm74_vm0, %v832_v9, 0.0  ;;  %913 = vmatpush3.bf16.msra.mxu1 %v1008_v15  ;;  %v1011_v37 = vld [vmem:[%s1374_s2 + $0x18] sm:$0xff]   ;;  %v1012_v40 = vld [vmem:[%s1374_s2 + $0x20] sm:$0xff]  }
  0x2a   :  { %v87_v22 = vsel %vm74_vm0, %v835_v11, 0.0  ;;  %v90_v23 = vsel %vm74_vm0, %v836_v12, 0.0  ;;  %v93_v24 = vsel %vm74_vm0, %v839_v13, 0.0  ;;  %v96_v25 = vsel %vm74_vm0, %v840_v14, 0.0  ;;  %76 = vadd.xlane.f32.xlu0 %v75_v17  ;;  %82 = vadd.xlane.f32.xlu1 %v81_v19  ;;  %v1013_v43 = vld [vmem:[%s1374_s2 + $0x28] sm:$0xff]   ;;  %v1014_v57 = vld [vmem:[%s1374_s2 + $0x30] sm:$0xff]  }
  0x2b   :  { %899 = vmatpush3.bf16.msra.mxu0 %v1005_v1  ;;  %v115_v26 = vadd.f32 %v78_v18, %v75_v17  ;;  %914 = vmatprep.subr.bf16.mxu1 %v1009_v21  ;;  %v1015_v58 = vld [vmem:[%s1374_s2 + $0x38] sm:$0xff]  }
  0x2c   :  { %900 = vmatprep.subr.bf16.mxu0 %v1006_v2 }
  0x2d   :  { %v116_v27 = vadd.f32 %v115_v26, %v81_v19  ;;  %915 = vmatpush3.bf16.msra.mxu1 %v1009_v21 }
  0x2e   :  { %79 = vadd.xlane.f32.xlu0 %v78_v18  ;;  %85 = vadd.xlane.f32.xlu1 %v84_v20 }
  0x2f   :  { %901 = vmatpush3.bf16.msra.mxu0 %v1006_v2  ;;  %v117_v28 = vadd.f32 %v116_v27, %v84_v20  ;;  %916 = vmatprep.subr.bf16.mxu1 %v1010_v34 }
  0x30   :  { %902 = vmatprep.subr.bf16.mxu0 %v1007_v16 }
  0x31   :  { %v118_v29 = vadd.f32 %v117_v28, %v87_v22  ;;  %917 = vmatpush3.bf16.msra.mxu1 %v1010_v34 }
  0x32   :  { %88 = vadd.xlane.f32.xlu0 %v87_v22  ;;  %91 = vadd.xlane.f32.xlu1 %v90_v23 }
  0x33   :  { %903 = vmatpush3.bf16.msra.mxu0 %v1007_v16  ;;  %v119_v30 = vadd.f32 %v118_v29, %v90_v23  ;;  %918 = vmatprep.subr.bf16.mxu1 %v1011_v37 }
  0x35   :  { %v120_v31 = vadd.f32 %v119_v30, %v93_v24  ;;  %919 = vmatpush3.bf16.msra.mxu1 %v1011_v37 }
  0x36   :  { %94 = vadd.xlane.f32.xlu0 %v93_v24  ;;  %97 = vadd.xlane.f32.xlu1 %v96_v25 }
  0x37   :  { %v121_v32 = vadd.f32 %v120_v31, %v96_v25  ;;  %920 = vmatprep.subr.bf16.mxu1 %v1012_v40 }
  0x39   :  { %v122_v33 = vrot.slane %v121_v32, 4  ;;  %921 = vmatpush3.bf16.msra.mxu1 %v1012_v40 }
  0x3a   :  { %922 = vmatprep.subr.bf16.mxu1 %v1013_v43 }
  0x3b   :  { %v123_v35 = vadd.f32 %v122_v33, %v121_v32 }
  0x3d   :  { %v124_v36 = vrot.slane %v123_v35, 2  ;;  %923 = vmatpush3.bf16.msra.mxu1 %v1013_v43 }
  0x3e   :  { %924 = vmatprep.subr.bf16.mxu1 %v1014_v57 }
  0x3f   :  { %v125_v38 = vadd.f32 %v124_v36, %v123_v35 }
  0x41   :  { %v126_v39 = vrot.slane %v125_v38, 1  ;;  %925 = vmatpush3.bf16.msra.mxu1 %v1014_v57 }
  0x42   :  { %926 = vmatprep.subr.bf16.mxu1 %v1015_v58 }
  0x43   :  { %v127_v41 = vadd.f32 %v126_v39, %v125_v38  ;;  %v794_v39 = vld [vmem:[%s1375_s3] ss:$0 sm:$0xff] }
  0x45   :  { %v128_v42 = vmax.f32 %v127_v41, 1.0  ;;  %927 = vmatpush3.bf16.msra.mxu1 %v1015_v58 }
  0x47   :  { %1032 = vrsqrt.f32 %v128_v42 }
  0x51   :  { %v1033_v44 = vpop.eup %1032 }
  0x52   :  { %v130_v45 = vmul.f32 %v1033_v44, %v827_v6  ;;  %v131_v46 = vmul.f32 %v1033_v44, %v828_v7  ;;  %v132_v47 = vmul.f32 %v1033_v44, %v831_v8  ;;  %v133_v48 = vmul.f32 %v1033_v44, %v832_v9 }
  0x53   :  { %v134_v49 = vmul.f32 %v1033_v44, %v835_v11  ;;  %v135_v50 = vmul.f32 %v1033_v44, %v836_v12  ;;  %v136_v54 = vmul.f32 %v1033_v44, %v839_v13  ;;  %v137_v55 = vmul.f32 %v1033_v44, %v840_v14 }
  0x54   :  { %v138_v51 = vpack.c.bf16 %v131_v46, %v130_v45  ;;  %v1253_v52 = vpack.c.bf16 %v133_v48, %v132_v47 }
  0x55   :  { %v1255_v53 = vpack.c.bf16 %v135_v50, %v134_v49  ;;  %v1266_v56 = vpack.c.bf16 %v137_v55, %v136_v54 }
  0x56   :  { %904 = vmatprep.mubr.msk.bf16.mxu0 %vm74_vm0, %v138_v51 }
  0x57   :  { %905 = vmatmul.mubr.msk.bf16.vlgmr.msra.gmra.mrb[0].mxu0 %vm74_vm0, %v1253_v52 }
  0x58   :  { %908 = vmatprep.mubr.msk.bf16.mxu0 %vm74_vm0, %v1255_v53 }
  0x5f   :  { %909 = vmatmul.mubr.msk.bf16.gmra.mrb[4].mxu0 %vm74_vm0, %v1266_v56 }
  0x60   :  { %944 = vmatprep.mubr.msk.bf16.mxu0 %vm74_vm0, %v138_v51 }
  0xb7   :  { %v77_v59 = vpop.xlane.xlu0 %76  ;;  %v83_v60 = vpop.xlane.xlu1 %82 }
  0xb8   :  { %v101_v0 = vmax.f32 %v83_v60, 1.0  ;;  %v99_v4 = vmax.f32 %v77_v59, 1.0 }
  0xba   :  { %1034 = vrsqrt.f32 %v101_v0 }
  0xbb   :  { %v80_v61 = vpop.xlane.xlu0 %79  ;;  %v86_v62 = vpop.xlane.xlu1 %85 }
  0xbc   :  { %v102_v2 = vmax.f32 %v86_v62, 1.0  ;;  %v100_v3 = vmax.f32 %v80_v61, 1.0 }
  0xbe   :  { %1036 = vrsqrt.f32 %v102_v2 }
  0xbf   :  { %v89_v63 = vpop.xlane.xlu0 %88  ;;  %v92_v1 = vpop.xlane.xlu1 %91  ;;  %1038 = vrsqrt.f32 %v100_v3 }
  0xc0   :  { %1040 = vrsqrt.f32 %v99_v4  ;;  %v103_v9 = vmax.f32 %v89_v63, 1.0  ;;  %v104_v10 = vmax.f32 %v92_v1, 1.0 }
  0xc3   :  { %v95_v5 = vpop.xlane.xlu0 %94  ;;  %v98_v6 = vpop.xlane.xlu1 %97 }
  0xc4   :  { %v105_v7 = vmax.f32 %v95_v5, 1.0  ;;  %v106_v8 = vmax.f32 %v98_v6, 1.0  ;;  %v1277_v11 = vpop.eup %1034 }
  0xc6   :  { %1042 = vrsqrt.f32 %v105_v7  ;;  %v1016_v7 = vld [vmem:[%s1376_s4] sm:$0xff]  }
  0xc7   :  { %1044 = vrsqrt.f32 %v106_v8  ;;  %v1017_v8 = vld [vmem:[%s1376_s4 + $0x8] sm:$0xff]  }
  0xc8   :  { %1046 = vrsqrt.f32 %v103_v9  ;;  %v1279_v12 = vpop.eup %1036  ;;  %v1018_v9 = vld [vmem:[%s1376_s4 + $0x10] sm:$0xff]  }
  0xc9   :  { %v1281_v14 = vpop.eup %1038  ;;  %1048 = vrsqrt.f32 %v104_v10  ;;  %v1019_v10 = vld [vmem:[%s1376_s4 + $0x18] sm:$0xff]  }
  0xca   :  { %v1283_v17 = vpop.eup %1040 }
  0xd0   :  { %v1289_v25 = vpop.eup %1042 }
  0xd1   :  { %v1291_v26 = vpop.eup %1044 }
  0xd2   :  { %v1293_v28 = vpop.eup %1046 }
  0xd3   :  { %v1295_v31 = vpop.eup %1048 }
 0x12a   :  { %v906_v13 = vpop.f32.mrb[0].mxu0 }
 0x12b   :  { %v220_v15 = vpop.f32.mrb[1].mxu0  ;;  %v253_v18 = vmul.f32 %v1277_v11, %v906_v13  ;;  %v1022_v13 = vld [vmem:[%s1376_s4 + $0x30] sm:$0xff]  }
 0x12c   :  { %v907_v16 = vpop.f32.mrb[2].mxu0  ;;  %v251_v21 = vmul.f32 %v1283_v17, %v220_v15  ;;  %v1024_v15 = vld [vmem:[#allocation4] sm:$0xff]  }
 0x12d   :  { %v254_v19 = vmul.f32 %v1279_v12, %v907_v16  ;;  %v223_v20 = vpop.f32.mrb[3].mxu0  ;;  %v1025_v16 = vld [vmem:[#allocation4 + $0x8] sm:$0xff]   ;;  %976 = vmatprep.subr.bf16.mxu1 %v1024_v15 }
 0x12e   :  { %v252_v22 = vmul.f32 %v1281_v14, %v223_v20  ;;  %v1028_v20 = vld [vmem:[#allocation4 + $0x20] sm:$0xff]  }
 0x12f   :  { %v260_v23 = vpack.c.bf16 %v254_v19, %v253_v18  ;;  %v1026_v18 = vld [vmem:[#allocation4 + $0x10] sm:$0xff]   ;;  %v1027_v19 = vld [vmem:[#allocation4 + $0x18] sm:$0xff]  }
 0x130   :  { %v259_v24 = vpack.c.bf16 %v252_v22, %v251_v21  ;;  %v1029_v21 = vld [vmem:[#allocation4 + $0x28] sm:$0xff]  }
 0x132   :  { %v910_v27 = vpop.f32.mrb[4].mxu0  ;;  %928 = vmatprep.mubr.bf16.mxu1 %v259_v24 }
 0x133   :  { %v236_v29 = vpop.f32.mrb[5].mxu0  ;;  %929 = vmatmul.mubr.bf16.vlgmr.msra.gmra.mrb[0].mxu1 %v260_v23  ;;  %v257_v32 = vmul.f32 %v1289_v25, %v910_v27 }
 0x134   :  { %v911_v30 = vpop.f32.mrb[6].mxu0  ;;  %v255_v35 = vmul.f32 %v1293_v28, %v236_v29  ;;  %977 = vmatpush3.bf16.msra.mxu1 %v1024_v15 }
 0x135   :  { %v258_v33 = vmul.f32 %v1291_v26, %v911_v30  ;;  %v239_v34 = vpop.f32.mrb[7].mxu0  ;;  %978 = vmatprep.subr.bf16.mxu1 %v1025_v16 }
 0x136   :  { %v256_v36 = vmul.f32 %v1295_v31, %v239_v34 }
 0x137   :  { %v262_v37 = vpack.c.bf16 %v258_v33, %v257_v32 }
 0x138   :  { %v261_v38 = vpack.c.bf16 %v256_v36, %v255_v35  ;;  %979 = vmatpush3.bf16.msra.mxu1 %v1025_v16 }
 0x139   :  { %980 = vmatprep.subr.bf16.mxu1 %v1026_v18 }
 0x13a   :  { %932 = vmatprep.mubr.bf16.mxu1 %v261_v38 }
 0x13b   :  { %933 = vmatmul.mubr.bf16.gmra.mrb[4].mxu1 %v262_v37 }
 0x13c   :  { %981 = vmatpush3.bf16.msra.mxu1 %v1026_v18 }
 0x13d   :  { %982 = vmatprep.subr.bf16.mxu1 %v1027_v19 }
 0x140   :  { %983 = vmatpush3.bf16.msra.mxu1 %v1027_v19 }
 0x141   :  { %984 = vmatprep.subr.bf16.mxu1 %v1028_v20 }
 0x144   :  { %985 = vmatpush3.bf16.msra.mxu1 %v1028_v20 }
 0x145   :  { %986 = vmatprep.subr.bf16.mxu1 %v1029_v21 }
 0x148   :  { %987 = vmatpush3.bf16.msra.mxu1 %v1029_v21 }
 0x206   :  { %v930_v40 = vpop.f32.mrb[0].mxu1 }
 0x207   :  { %v377_v41 = vadd.f32 %v930_v40, %v794_v39  ;;  %v368_v42 = vpop.f32.mrb[1].mxu1 }
 0x208   :  { %v369_v43 = vadd.f32 %v794_v39, %v368_v42  ;;  %v931_v44 = vpop.f32.mrb[2].mxu1 }
 0x209   :  { %v380_v45 = vadd.f32 %v931_v44, %v794_v39  ;;  %v371_v46 = vpop.f32.mrb[3].mxu1  ;;  %v401_v48 = vmax.f32 %v377_v41, 0.0 }
 0x20a   :  { %v372_v47 = vadd.f32 %v794_v39, %v371_v46  ;;  %v399_v50 = vmax.f32 %v369_v43, 0.0  ;;  %v1031_v43 = vld [vmem:[#allocation4 + $0x38] sm:$0xff]  }
 0x20b   :  { %v402_v49 = vmax.f32 %v380_v45, 0.0 }
 0x20c   :  { %v400_v51 = vmax.f32 %v372_v47, 0.0 }
 0x20d   :  { %v408_v54 = vpack.c.bf16 %v402_v49, %v401_v48 }
 0x20e   :  { %v407_v55 = vpack.c.bf16 %v400_v51, %v399_v50  ;;  %v934_v57 = vpop.f32.mrb[4].mxu1 }
 0x20f   :  { %v393_v58 = vadd.f32 %v934_v57, %v794_v39  ;;  %v384_v59 = vpop.f32.mrb[5].mxu1 }
 0x210   :  { %v385_v60 = vadd.f32 %v794_v39, %v384_v59  ;;  %v935_v61 = vpop.f32.mrb[6].mxu1  ;;  %936 = vmatprep.subr.bf16.mxu0 %v407_v55 }
 0x211   :  { %v396_v62 = vadd.f32 %v935_v61, %v794_v39  ;;  %v387_v63 = vpop.f32.mrb[7].mxu1  ;;  %937 = vmatpush3.bf16.msra.mxu0 %v407_v55  ;;  %v405_v1 = vmax.f32 %v393_v58, 0.0 }
 0x212   :  { %v388_v0 = vadd.f32 %v794_v39, %v387_v63  ;;  %938 = vmatprep.subr.bf16.mxu0 %v408_v54  ;;  %v403_v3 = vmax.f32 %v385_v60, 0.0 }
 0x213   :  { %v406_v2 = vmax.f32 %v396_v62, 0.0 }
 0x214   :  { %v404_v4 = vmax.f32 %v388_v0, 0.0 }
 0x215   :  { %v410_v5 = vpack.c.bf16 %v406_v2, %v405_v1  ;;  %939 = vmatpush3.bf16.msra.mxu0 %v408_v54 }
 0x216   :  { %v409_v6 = vpack.c.bf16 %v404_v4, %v403_v3 }
 0x218   :  { %940 = vmatprep.subr.bf16.mxu0 %v409_v6 }
 0x219   :  { %941 = vmatpush3.bf16.msra.mxu0 %v409_v6 }
 0x21a   :  { %942 = vmatprep.subr.bf16.mxu0 %v410_v5 }
 0x21d   :  { %943 = vmatpush3.bf16.msra.mxu0 %v410_v5 }
 0x21e   :  { %952 = vmatprep.subr.bf16.mxu0 %v1016_v7 }
 0x220   :  { %945 = vmatmul.mubr.msk.bf16.vlgmr.msra.gmra.mrb[8].mxu0 %vm74_vm0, %v1253_v52  ;;  %v1020_v52 = vld [vmem:[%s1376_s4 + $0x20] sm:$0xff]  }
 0x221   :  { %948 = vmatprep.mubr.msk.bf16.mxu0 %vm74_vm0, %v1255_v53  ;;  %953 = vmatpush3.bf16.msra.mxu0 %v1016_v7  ;;  %v1021_v53 = vld [vmem:[%s1376_s4 + $0x28] sm:$0xff]  }
 0x222   :  { %954 = vmatprep.subr.bf16.mxu0 %v1017_v8 }
 0x225   :  { %955 = vmatpush3.bf16.msra.mxu0 %v1017_v8  ;;  %v816_v8 = vld [vmem:[%s1379_s7] ss:$0 sm:$0xff] }
 0x226   :  { %956 = vmatprep.subr.bf16.mxu0 %v1018_v9 }
 0x228   :  { %949 = vmatmul.mubr.msk.bf16.gmra.mrb[12].mxu0 %vm74_vm0, %v1266_v56  ;;  %v1023_v56 = vld [vmem:[%s1376_s4 + $0x38] sm:$0xff]  }
 0x229   :  { %957 = vmatpush3.bf16.msra.mxu0 %v1018_v9 }
 0x22a   :  { %958 = vmatprep.subr.bf16.mxu0 %v1019_v10 }
 0x22d   :  { %959 = vmatpush3.bf16.msra.mxu0 %v1019_v10 }
 0x22e   :  { %960 = vmatprep.subr.bf16.mxu0 %v1020_v52 }
 0x231   :  { %961 = vmatpush3.bf16.msra.mxu0 %v1020_v52 }
 0x232   :  { %962 = vmatprep.subr.bf16.mxu0 %v1021_v53 }
 0x235   :  { %963 = vmatpush3.bf16.msra.mxu0 %v1021_v53 }
 0x236   :  { %964 = vmatprep.subr.bf16.mxu0 %v1022_v13 }
 0x239   :  { %965 = vmatpush3.bf16.msra.mxu0 %v1022_v13 }
 0x23a   :  { %966 = vmatprep.subr.bf16.mxu0 %v1023_v56 }
 0x23d   :  { %967 = vmatpush3.bf16.msra.mxu0 %v1023_v56 }
 0x2f3   :  { %v946_v22 = vpop.f32.mrb[8].mxu0 }
 0x2f4   :  { %v445_v23 = vpop.f32.mrb[9].mxu0  ;;  %v478_v27 = vmul.f32 %v1277_v11, %v946_v22 }
 0x2f5   :  { %v947_v24 = vpop.f32.mrb[10].mxu0  ;;  %v476_v32 = vmul.f32 %v1283_v17, %v445_v23 }
 0x2f6   :  { %v479_v29 = vmul.f32 %v1279_v12, %v947_v24  ;;  %v448_v30 = vpop.f32.mrb[11].mxu0 }
 0x2f7   :  { %v477_v33 = vmul.f32 %v1281_v14, %v448_v30  ;;  %v1030_v14 = vld [vmem:[#allocation4 + $0x30] sm:$0xff]  }
 0x2f8   :  { %v485_v34 = vpack.c.bf16 %v479_v29, %v478_v27  ;;  %988 = vmatprep.subr.bf16.mxu1 %v1030_v14 }
 0x2f9   :  { %v484_v35 = vpack.c.bf16 %v477_v33, %v476_v32  ;;  %989 = vmatpush3.bf16.msra.mxu1 %v1030_v14 }
 0x2fa   :  { %990 = vmatprep.subr.bf16.mxu1 %v1031_v43 }
 0x2fb   :  { %v950_v36 = vpop.f32.mrb[12].mxu0  ;;  %968 = vmatprep.mubr.bf16.mxu0 %v484_v35 }
 0x2fc   :  { %v461_v37 = vpop.f32.mrb[13].mxu0  ;;  %969 = vmatmul.mubr.bf16.vlgmr.msra.gmra.mrb[16].mxu0 %v485_v34  ;;  %v482_v39 = vmul.f32 %v1289_v25, %v950_v36  ;;  %v807_v25 = vld [vmem:[%s1377_s5] ss:$0 sm:$0xff] }
 0x2fd   :  { %v951_v38 = vpop.f32.mrb[14].mxu0  ;;  %v480_v11 = vmul.f32 %v1293_v28, %v461_v37  ;;  %991 = vmatpush3.bf16.msra.mxu1 %v1031_v43 }
 0x2fe   :  { %v483_v40 = vmul.f32 %v1291_v26, %v951_v38  ;;  %v464_v41 = vpop.f32.mrb[15].mxu0 }
 0x2ff   :  { %v481_v12 = vmul.f32 %v1295_v31, %v464_v41 }
 0x300   :  { %v487_v42 = vpack.c.bf16 %v483_v40, %v482_v39 }
 0x301   :  { %v486_v17 = vpack.c.bf16 %v481_v12, %v480_v11 }
 0x303   :  { %972 = vmatprep.mubr.bf16.mxu0 %v486_v17 }
 0x304   :  { %973 = vmatmul.mubr.bf16.gmra.mrb[20].mxu0 %v487_v42 }
 0x3cf   :  { %v970_v26 = vpop.f32.mrb[16].mxu0 }
 0x3d0   :  { %v602_v44 = vadd.f32 %v970_v26, %v807_v25  ;;  %v593_v45 = vpop.f32.mrb[17].mxu0 }
 0x3d1   :  { %v594_v28 = vadd.f32 %v807_v25, %v593_v45  ;;  %v971_v46 = vpop.f32.mrb[18].mxu0 }
 0x3d2   :  { %v605_v31 = vadd.f32 %v971_v46, %v807_v25  ;;  %v596_v47 = vpop.f32.mrb[19].mxu0  ;;  %v626_v49 = vmax.f32 %v602_v44, 0.0 }
 0x3d3   :  { %v597_v48 = vadd.f32 %v807_v25, %v596_v47  ;;  %v624_v51 = vmax.f32 %v594_v28, 0.0 }
 0x3d4   :  { %v627_v50 = vmax.f32 %v605_v31, 0.0 }
 0x3d5   :  { %v625_v54 = vmax.f32 %v597_v48, 0.0 }
 0x3d6   :  { %v633_v55 = vpack.c.bf16 %v627_v50, %v626_v49 }
 0x3d7   :  { %v632_v57 = vpack.c.bf16 %v625_v54, %v624_v51  ;;  %v974_v58 = vpop.f32.mrb[20].mxu0 }
 0x3d8   :  { %v618_v59 = vadd.f32 %v974_v58, %v807_v25  ;;  %v609_v60 = vpop.f32.mrb[21].mxu0 }
 0x3d9   :  { %v610_v61 = vadd.f32 %v807_v25, %v609_v60  ;;  %v975_v62 = vpop.f32.mrb[22].mxu0  ;;  %992 = vmatprep.mubr.bf16.mxu1 %v632_v57 }
 0x3da   :  { %v621_v63 = vadd.f32 %v975_v62, %v807_v25  ;;  %v612_v0 = vpop.f32.mrb[23].mxu0  ;;  %993 = vmatmul.mubr.bf16.vlgmr.msra.gmra.mrb[8].mxu1 %v633_v55  ;;  %v630_v2 = vmax.f32 %v618_v59, 0.0 }
 0x3db   :  { %v613_v1 = vadd.f32 %v807_v25, %v612_v0  ;;  %v628_v4 = vmax.f32 %v610_v61, 0.0 }
 0x3dc   :  { %v631_v3 = vmax.f32 %v621_v63, 0.0 }
 0x3dd   :  { %v629_v5 = vmax.f32 %v613_v1, 0.0 }
 0x3de   :  { %v635_v6 = vpack.c.bf16 %v631_v3, %v630_v2 }
 0x3df   :  { %v634_v7 = vpack.c.bf16 %v629_v5, %v628_v4 }
 0x3e1   :  { %996 = vmatprep.mubr.bf16.mxu1 %v634_v7 }
 0x3e2   :  { %997 = vmatmul.mubr.bf16.gmra.mrb[12].mxu1 %v635_v6 }
 0x4ad   :  { %v994_v9 = vpop.f32.mrb[8].mxu1 }
 0x4ae   :  { %v750_v10 = vadd.f32 %v994_v9, %v816_v8  ;;  %v741_v52 = vpop.f32.mrb[9].mxu1 }
 0x4af   :  { %v742_v53 = vadd.f32 %v816_v8, %v741_v52  ;;  %v995_v13 = vpop.f32.mrb[10].mxu1 }
 0x4b0   :  { %774 = vst [vmem:[%s1380_s8 + $0x10] sm:$0xff] %v750_v10  ;;  %v753_v56 = vadd.f32 %v995_v13, %v816_v8  ;;  %v744_v15 = vpop.f32.mrb[11].mxu1 }
 0x4b1   :  { %772 = vst [vmem:[%s1380_s8] sm:$0xff] %v742_v53  ;;  %v745_v16 = vadd.f32 %v816_v8, %v744_v15 }
 0x4b2   :  { %775 = vst [vmem:[%s1380_s8 + $0x18] sm:$0xff] %v753_v56 }
 0x4b3   :  { %773 = vst [vmem:[%s1380_s8 + $0x8] sm:$0xff] %v745_v16 }
 0x4b5   :  { %v998_v18 = vpop.f32.mrb[12].mxu1 }
 0x4b6   :  { %v766_v19 = vadd.f32 %v998_v18, %v816_v8  ;;  %v757_v20 = vpop.f32.mrb[13].mxu1 }
 0x4b7   :  { %v758_v21 = vadd.f32 %v816_v8, %v757_v20  ;;  %v999_v22 = vpop.f32.mrb[14].mxu1 }
 0x4b8   :  { %778 = vst [vmem:[%s1380_s8 + $0x30] sm:$0xff] %v766_v19  ;;  %v769_v23 = vadd.f32 %v999_v22, %v816_v8  ;;  %v760_v24 = vpop.f32.mrb[15].mxu1 }
 0x4b9   :  { %776 = vst [vmem:[%s1380_s8 + $0x20] sm:$0xff] %v758_v21  ;;  %v761_v27 = vadd.f32 %v816_v8, %v760_v24 }
 0x4ba   :  { %779 = vst [vmem:[%s1380_s8 + $0x38] sm:$0xff] %v769_v23 }
 0x4bb   :  { %777 = vst [vmem:[%s1380_s8 + $0x28] sm:$0xff] %v761_v27 }
 0x4bc   :  { %784 = vsyncpa [#allocation3], 1 }
 0x4bd   :  { %785 = vsyncpa [#allocation5], 1 }

</bundles_post_ra>
